<compile_context>
chip_gen: v6e
topology: v6e:2x2x1
jax: 0.10.0
libtpu: 0.0.40
codegen_flags: <defaults>
</compile_context>

<pallas_src>
import functools

import jax
import jax.numpy as jnp
from jax.experimental import pallas as pl
from jax.experimental.pallas import tpu as pltpu


def _mlp_kernel(x_ref, w1_ref, b1_ref, w2_ref, b2_ref, o_ref):
    # bf16 cast in-VMEM (MXU-native on v5e/v6e/v7x), f32 accumulation; the
    # bias + ReLU epilogue stays in f32 on the VPU.
    x = x_ref[...].astype(jnp.bfloat16)
    h = jnp.dot(x, w1_ref[...], preferred_element_type=jnp.float32)
    h = jnp.maximum(h + b1_ref[...], 0.0)
    y = jnp.dot(h.astype(jnp.bfloat16), w2_ref[...],
                preferred_element_type=jnp.float32)
    o_ref[...] = (y + b2_ref[...]).astype(o_ref.dtype)


def _round_up(n, m):
    return ((n + m - 1) // m) * m


def _pick_batch_tile(B):
    # Always produce a multi-step grid once the batch is big enough: that
    # enables pipelining and lets "parallel" shard across v7x's 2 TensorCores.
    # Large batches get 512/1024-row tiles (~85% of HBM roofline in measured
    # tiled-copy data) and a partial last block via pl.cdiv -- never tb=B.
    if B >= 4096:
        return 1024
    if B >= 1024:
        return 512
    if B >= 512:
        return 256
    if B >= 256:
        return 128
    return B  # tiny batch: single tile (launch-overhead dominated)


def prepare_params(w1, b1, w2, b2):
    """Pad hidden dim to a lane multiple and cast weights to bf16, ONCE.

    w1: (inp_dim, hid); b1: (hid,); w2: (hid, out); b2: (out,).
    Padding is inert: padded hidden units see bias 0 -> relu(0)=0 and multiply
    zero rows of W2.  The output dim is left unpadded so the kernel's store is
    exactly (tb, out_dim).
    """
    hid_dim = w1.shape[1]
    H = _round_up(hid_dim, 128)
    w1_p = jnp.pad(w1, ((0, 0), (0, H - hid_dim))).astype(jnp.bfloat16)
    b1_p = jnp.pad(b1, (0, H - hid_dim)).reshape(1, H).astype(jnp.float32)
    w2_p = jnp.pad(w2, ((0, H - hid_dim), (0, 0))).astype(jnp.bfloat16)
    b2_p = b2.reshape(1, -1).astype(jnp.float32)
    return w1_p, b1_p, w2_p, b2_p


def inverse_dynamics_forward(x, w1_p, b1_p, w2_p, b2_p, *, tb=None):
    """x: (B, inp_dim) f32; params pre-padded/cast by prepare_params()."""
    B, inp_dim = x.shape
    H = w1_p.shape[1]
    out_dim = w2_p.shape[1]

    if tb is None:
        tb = _pick_batch_tile(B)
    grid = (pl.cdiv(B, tb),)

    # VMEM budget: double-buffered x/out tiles + (double-buffered) resident
    # weights/biases, accounting for lane padding of narrow last dims, plus
    # 25% internal-scratch headroom.  Clamp to [4 MiB, 32 MiB]: explicit limit
    # lets 512/1024-row tiles through v5e's 16 MiB scoped default while
    # staying safe inside v7x's 64 MiB physical VMEM.
    lane = 128
    x_tile = tb * _round_up(inp_dim, lane) * 4
    o_tile = tb * _round_up(out_dim, lane) * 4
    w_bytes = (_round_up(inp_dim, 16) * H * 2      # w1 bf16
               + H * _round_up(out_dim, lane) * 2  # w2 bf16
               + 8 * H * 4                         # b1 f32
               + 8 * _round_up(out_dim, lane) * 4)  # b2 f32
    tile_bytes = 2 * (x_tile + o_tile + w_bytes)
    vmem_limit = int(min(max(tile_bytes * 5 // 4, 4 << 20), 32 << 20))

    # Unpadded flops / true HBM bytes for the scheduler hint.
    cost = pl.CostEstimate(
        flops=2 * B * (inp_dim * H + H * out_dim),
        transcendentals=0,
        bytes_accessed=(x.size * 4 + w1_p.size * 2 + w2_p.size * 2
                        + b1_p.size * 4 + b2_p.size * 4 + B * out_dim * 4),
    )

    return pl.pallas_call(
        _mlp_kernel,
        out_shape=jax.ShapeDtypeStruct((B, out_dim), x.dtype),
        grid_spec=pl.GridSpec(
            grid=grid,
            in_specs=[
                pl.BlockSpec((tb, inp_dim), lambda i: (i, 0)),  # x tile, f32, unpadded
                pl.BlockSpec((inp_dim, H), lambda i: (0, 0)),   # W1 resident (bf16)
                pl.BlockSpec((1, H), lambda i: (0, 0)),         # b1 (f32)
                pl.BlockSpec((H, out_dim), lambda i: (0, 0)),   # W2 resident (bf16)
                pl.BlockSpec((1, out_dim), lambda i: (0, 0)),   # b2 (f32)
            ],
            out_specs=pl.BlockSpec((tb, out_dim), lambda i: (i, 0)),  # unpadded out
        ),
        compiler_params=pltpu.CompilerParams(
            dimension_semantics=("parallel",),
            vmem_limit_bytes=vmem_limit,
        ),
        cost_estimate=cost,
    )(x, w1_p, b1_p, w2_p, b2_p)


def _reference(x, w1, b1, w2, b2):
    h = jnp.maximum(x @ w1 + b1, 0.0)
    return h @ w2 + b2


if __name__ == "__main__":
    # Module dims (synthetic, deterministic init).  Batch 256 -> 2-step
    # parallel grid (exercises pipelining / v7x megacore path).
    batch = 256
    inp_dim = 16   # e.g. observation_dim * 2
    hid_dim = 32
    out_dim = 8    # action_dim

    key = jax.random.PRNGKey(0)
    kx, k1, kb1, k2, kb2 = jax.random.split(key, 5)

    x = jax.random.normal(kx, (batch, inp_dim), dtype=jnp.float32)

    # PyTorch Linear default init: U(-1/sqrt(fan_in), 1/sqrt(fan_in)); weights
    # stored pre-transposed for x @ W.
    lim1 = 1.0 / jnp.sqrt(inp_dim)
    w1 = jax.random.uniform(k1, (inp_dim, hid_dim), jnp.float32, -lim1, lim1)
    b1 = jax.random.uniform(kb1, (hid_dim,), jnp.float32, -lim1, lim1)
    lim2 = 1.0 / jnp.sqrt(hid_dim)
    w2 = jax.random.uniform(k2, (hid_dim, out_dim), jnp.float32, -lim2, lim2)
    b2 = jax.random.uniform(kb2, (out_dim,), jnp.float32, -lim2, lim2)

    # Parameter pad/cast hoisted out of the hot path (done once).
    params = jax.tree.map(jax.block_until_ready, prepare_params(w1, b1, w2, b2))

    fwd = jax.jit(inverse_dynamics_forward)
    out = jax.block_until_ready(fwd(x, *params))

    ref = _reference(x, w1, b1, w2, b2)
    assert out.shape == (batch, out_dim), out.shape
    # bf16 MXU inputs with f32 accumulation -> bf16-appropriate tolerance.
    assert jnp.allclose(out, ref, atol=2e-2, rtol=2e-2), "mismatch vs reference"

    print("KERNEL_OK")
</pallas_src>

<mosaic_0001>
module attributes {stable_mosaic.version = 11 : i64} {
  func.func @_mlp_kernel(%arg0: i32, %arg1: memref<128x16xf32, #tpu.memory_space<vmem>>, %arg2: memref<16x128xbf16, #tpu.memory_space<vmem>>, %arg3: memref<1x128xf32, #tpu.memory_space<vmem>>, %arg4: memref<128x8xbf16, #tpu.memory_space<vmem>>, %arg5: memref<1x8xf32, #tpu.memory_space<vmem>>, %arg6: memref<128x8xf32, #tpu.memory_space<vmem>>) attributes {dimension_semantics = [#tpu.dimension_semantics<parallel>], iteration_bounds = array<i64: 2>, scalar_prefetch = 0 : i64, scratch_operands = 0 : i64, tpu.core_type = #tpu.core_type<tc>, window_params = [{transform_indices = @transform_0, window_bounds = array<i64: 128, 16>}, {pipeline_mode = #tpu.pipeline_mode<synchronous>, transform_indices = @transform_1, window_bounds = array<i64: 16, 128>}, {pipeline_mode = #tpu.pipeline_mode<synchronous>, transform_indices = @transform_2, window_bounds = array<i64: 1, 128>}, {pipeline_mode = #tpu.pipeline_mode<synchronous>, transform_indices = @transform_3, window_bounds = array<i64: 128, 8>}, {pipeline_mode = #tpu.pipeline_mode<synchronous>, transform_indices = @transform_4, window_bounds = array<i64: 1, 8>}, {transform_indices = @transform_5, window_bounds = array<i64: 128, 8>}]} {
    %c0 = arith.constant 0 : index
    %c0_0 = arith.constant 0 : index
    %0 = vector.load %arg1[%c0, %c0_0] : memref<128x16xf32, #tpu.memory_space<vmem>>, vector<128x16xf32>
    %1 = arith.truncf %0 : vector<128x16xf32> to vector<128x16xbf16>
    %c0_1 = arith.constant 0 : index
    %c0_2 = arith.constant 0 : index
    %2 = vector.load %arg2[%c0_1, %c0_2] : memref<16x128xbf16, #tpu.memory_space<vmem>>, vector<16x128xbf16>
    %cst = arith.constant dense<0.000000e+00> : vector<128x128xf32>
    %3 = tpu.matmul %1, %2, %cst {dimension_numbers = #tpu.dot_dimension_numbers<[1], [0], [0], [1], [0, 0, 1, 1], [], []>} : vector<128x16xbf16>, vector<16x128xbf16>, vector<128x128xf32> -> vector<128x128xf32>
    %c0_3 = arith.constant 0 : index
    %c0_4 = arith.constant 0 : index
    %4 = vector.load %arg3[%c0_3, %c0_4] : memref<1x128xf32, #tpu.memory_space<vmem>>, vector<1x128xf32>
    %5 = vector.broadcast %4 : vector<1x128xf32> to vector<128x128xf32>
    %6 = arith.addf %3, %5 : vector<128x128xf32>
    %cst_5 = arith.constant 0.000000e+00 : f32
    %7 = vector.broadcast %cst_5 : f32 to vector<128x128xf32>
    %8 = arith.maximumf %6, %7 : vector<128x128xf32>
    %9 = arith.truncf %8 : vector<128x128xf32> to vector<128x128xbf16>
    %c0_6 = arith.constant 0 : index
    %c0_7 = arith.constant 0 : index
    %10 = vector.load %arg4[%c0_6, %c0_7] : memref<128x8xbf16, #tpu.memory_space<vmem>>, vector<128x8xbf16>
    %cst_8 = arith.constant dense<0.000000e+00> : vector<128x8xf32>
    %11 = tpu.matmul %9, %10, %cst_8 {dimension_numbers = #tpu.dot_dimension_numbers<[1], [0], [0], [1], [0, 0, 1, 1], [], []>} : vector<128x128xbf16>, vector<128x8xbf16>, vector<128x8xf32> -> vector<128x8xf32>
    %c0_9 = arith.constant 0 : index
    %c0_10 = arith.constant 0 : index
    %12 = vector.load %arg5[%c0_9, %c0_10] : memref<1x8xf32, #tpu.memory_space<vmem>>, vector<1x8xf32>
    %13 = vector.broadcast %12 : vector<1x8xf32> to vector<128x8xf32>
    %14 = arith.addf %11, %13 : vector<128x8xf32>
    %c0_11 = arith.constant 0 : index
    %c0_12 = arith.constant 0 : index
    %15 = vector.load %arg6[%c0_11, %c0_12] : memref<128x8xf32, #tpu.memory_space<vmem>>, vector<128x8xf32>
    tpu.vector_store %arg6[%c0_11, %c0_12], %14 {strides = array<i32>} : memref<128x8xf32, #tpu.memory_space<vmem>>, vector<128x8xf32>,
    return
  }
  func.func @transform_0(%arg0: i32) -> (i32, i32) {
    %c0_i32 = arith.constant 0 : i32
    %c0_i32_0 = arith.constant 0 : i32
    return %arg0, %c0_i32 : i32, i32
  }
  func.func @transform_1(%arg0: i32) -> (i32, i32) {
    %c0_i32 = arith.constant 0 : i32
    %c0_i32_0 = arith.constant 0 : i32
    %c0_i32_1 = arith.constant 0 : i32
    return %c0_i32, %c0_i32_0 : i32, i32
  }
  func.func @transform_2(%arg0: i32) -> (i32, i32) {
    %c0_i32 = arith.constant 0 : i32
    %c0_i32_0 = arith.constant 0 : i32
    %c0_i32_1 = arith.constant 0 : i32
    return %c0_i32, %c0_i32_0 : i32, i32
  }
  func.func @transform_3(%arg0: i32) -> (i32, i32) {
    %c0_i32 = arith.constant 0 : i32
    %c0_i32_0 = arith.constant 0 : i32
    %c0_i32_1 = arith.constant 0 : i32
    return %c0_i32, %c0_i32_0 : i32, i32
  }
  func.func @transform_4(%arg0: i32) -> (i32, i32) {
    %c0_i32 = arith.constant 0 : i32
    %c0_i32_0 = arith.constant 0 : i32
    %c0_i32_1 = arith.constant 0 : i32
    return %c0_i32, %c0_i32_0 : i32, i32
  }
  func.func @transform_5(%arg0: i32) -> (i32, i32) {
    %c0_i32 = arith.constant 0 : i32
    %c0_i32_0 = arith.constant 0 : i32
    return %arg0, %c0_i32 : i32, i32
  }
}

</mosaic_0001>

<bundles_post_ra>
// kernel: inverse_dynamics_forward.1
= control target key start
LH: loop header
LB: loop body
LE: loop exit
PB: predicated region body
PF: predicated region fallthrough
CT: control target
= control target key end

     0   :  { %s831_s18 = smov 0   ;;  %s948_s0 = inlined_call_operand.vmem [shape: f32[256,16], index: 0, kind: input, shape index: {}]   ;;  %s949_s1 = inlined_call_operand.vmem [shape: bf16[16,128], index: 1, kind: input, shape index: {}]   ;;  %s950_s2 = inlined_call_operand.vmem [shape: f32[1,128], index: 2, kind: input, shape index: {}]   ;;  %s951_s3 = inlined_call_operand.vmem [shape: bf16[128,8], index: 3, kind: input, shape index: {}]   ;;  %s952_s4 = inlined_call_operand.vmem [shape: f32[1,8], index: 4, kind: input, shape index: {}]   ;;  %s953_s5 = inlined_call_operand.vmem [shape: f32[256,8], index: 5, kind: output, shape index: {}]  }
   0x1 LB: > { %s655_s19 = sadd.s32 4294967295, %s799_s18   ;;  %p659_p0 = scmp.ge.s32.totalorder %s799_s18, 1  ;;  %s799_s18 = sphi %s831_s18, %s15_s18  }
   0x2   : > { %p188_p1 = scmp.lt.s32.totalorder %s799_s18, 3 }
   0x4   : > { %p189_p2 = pnand %p659_p0, %p188_p1 }
   0x5   : > { %s660_s22 = sshll.u32 (!%p189_p2), %s655_s19, 4 }
   0x6   : > { %192 = sbr.rel (%p189_p2) target bundleno = 450 (0x1c2), region = 40  ;;  %p217_p3 = scmp.lt.s32.totalorder (!%p189_p2), %s660_s22, 31 }
   0xb   : > { %v784_v0 = vld [vmem:[%s949_s1] sm:$0xff]   ;;  %v785_v1 = vld [vmem:[%s951_s3 + $0x38] sm:$0xff]   ;;  %s955_s22 = smov (!%p217_p3, %s660_s22), 31  ;;  %v786_v2 = vld [vmem:[%s951_s3 + $0x30] sm:$0xff]   ;;  %vm268_vm0 = vcmask 130048   ;;  %vm582_vm1 = vcmask 64512  }
   0xc   : > { %710 = vmatprep.subr.bf16.mxu0 %v784_v0  ;;  %760 = vmatprep.subr.bf16.mxu1 %v785_v1  ;;  %s661_s27 = sshll.u32 %s955_s22, 3  ;;  %v787_v3 = vld [vmem:[%s951_s3 + $0x28] sm:$0xff]   ;;  %v788_v15 = vld [vmem:[%s951_s3 + $0x20] sm:$0xff]   ;;  %v789_v20 = vld [vmem:[%s951_s3 + $0x18] sm:$0xff]  }
   0xd   : > { %711 = vmatpush3.bf16.msra.mxu0 %v784_v0  ;;  %768 = vmatpush3.bf16.msra.mxu1 %v785_v1  ;;  %s856_s30 = scalar_lea.vmem %s948_s0, %s661_s27  ;;  %v790_v30 = vld [vmem:[%s951_s3 + $0x10] sm:$0xff]   ;;  %v791_v31 = vld [vmem:[%s951_s3 + $0x8] sm:$0xff]   ;;  %v792_v32 = vld [vmem:[%s951_s3] sm:$0xff]   ;;  %s911_s26 = scalar_lea.vmem %s953_s5, %s661_s27 }
   0xe   : > { %728 = vmatprep.subr.bf16.mxu0 %v785_v1  ;;  %761 = vmatprep.subr.bf16.mxu1 %v786_v2  ;;  %v229_v4 = vld [vmem:[%s856_s30] sm:$0xff]  ;;  %v230_v5 = vld [vmem:[%s856_s30 + $0x8] sm:$0xff]  ;;  %v231_v6 = vld [vmem:[%s856_s30 + $0x10] sm:$0xff] }
   0xf   : > { %v245_v7 = vpack.c.bf16 %v230_v5, %v229_v4  ;;  %v232_v8 = vld [vmem:[%s856_s30 + $0x18] sm:$0xff]  ;;  %v233_v9 = vld [vmem:[%s856_s30 + $0x20] sm:$0xff]  ;;  %v234_v10 = vld [vmem:[%s856_s30 + $0x28] sm:$0xff] }
  0x10   : > { %v246_v11 = vpack.c.bf16 %v232_v8, %v231_v6  ;;  %v247_v12 = vpack.c.bf16 %v234_v10, %v233_v9  ;;  %v235_v13 = vld [vmem:[%s856_s30 + $0x30] sm:$0xff]  ;;  %v236_v14 = vld [vmem:[%s856_s30 + $0x38] sm:$0xff]  ;;  %v237_v16 = vld [vmem:[%s856_s30 + $0x40] sm:$0xff] }
  0x11   : > { %769 = vmatpush3.bf16.msra.mxu1 %v786_v2  ;;  %712 = vmatprep.mubr.msk.bf16.mxu0 %vm268_vm0, %v245_v7  ;;  %v238_v17 = vld [vmem:[%s856_s30 + $0x48] sm:$0xff]  ;;  %v248_v18 = vpack.c.bf16 %v236_v14, %v235_v13  ;;  %v239_v21 = vld [vmem:[%s856_s30 + $0x50] sm:$0xff]  ;;  %v240_v22 = vld [vmem:[%s856_s30 + $0x58] sm:$0xff] }
  0x12   : > { %762 = vmatprep.subr.bf16.mxu1 %v787_v3  ;;  %713 = vmatmul.mubr.msk.bf16.vlgmr.msra.gmra.mxu0 %vm268_vm0, %v246_v11  ;;  %v249_v19 = vpack.c.bf16 %v238_v17, %v237_v16  ;;  %v241_v23 = vld [vmem:[%s856_s30 + $0x60] sm:$0xff]  ;;  %v242_v24 = vld [vmem:[%s856_s30 + $0x68] sm:$0xff]  ;;  %v250_v25 = vpack.c.bf16 %v240_v22, %v239_v21  ;;  %v243_v27 = vld [vmem:[%s856_s30 + $0x70] sm:$0xff] }
  0x13   : > { %716 = vmatprep.mubr.msk.bf16.mxu0 %vm268_vm0, %v247_v12  ;;  %729 = vmatpush3.bf16.msra.mxu0 %v785_v1  ;;  %v251_v26 = vpack.c.bf16 %v242_v24, %v241_v23  ;;  %v244_v28 = vld [vmem:[%s856_s30 + $0x78] sm:$0xff]  ;;  %v664_v35 = vld [vmem:[%s950_s2] ss:$0 sm:$0xff] }
  0x14   : > { %730 = vmatprep.subr.bf16.mxu0 %v786_v2  ;;  %v252_v29 = vpack.c.bf16 %v244_v28, %v243_v27 }
  0x15   : > { %770 = vmatpush3.bf16.msra.mxu1 %v787_v3 }
  0x16   : > { %763 = vmatprep.subr.bf16.mxu1 %v788_v15 }
  0x17   : > { %731 = vmatpush3.bf16.msra.mxu0 %v786_v2 }
  0x18   : > { %732 = vmatprep.subr.bf16.mxu0 %v787_v3 }
  0x19   : > { %771 = vmatpush3.bf16.msra.mxu1 %v788_v15 }
  0x1a   : > { %764 = vmatprep.subr.bf16.mxu1 %v789_v20  ;;  %717 = vmatmul.mubr.msk.bf16.gmra.mxu0 %vm268_vm0, %v248_v18 }
  0x1b   : > { %720 = vmatprep.mubr.msk.bf16.mxu0 %vm268_vm0, %v249_v19  ;;  %733 = vmatpush3.bf16.msra.mxu0 %v787_v3 }
  0x1c   : > { %734 = vmatprep.subr.bf16.mxu0 %v788_v15 }
  0x1d   : > { %772 = vmatpush3.bf16.msra.mxu1 %v789_v20 }
  0x1e   : > { %765 = vmatprep.subr.bf16.mxu1 %v790_v30 }
  0x1f   : > { %735 = vmatpush3.bf16.msra.mxu0 %v788_v15 }
  0x20   : > { %736 = vmatprep.subr.bf16.mxu0 %v789_v20 }
  0x21   : > { %773 = vmatpush3.bf16.msra.mxu1 %v790_v30 }
  0x22   : > { %721 = vmatmul.mubr.msk.bf16.gmra.mxu0 %vm268_vm0, %v250_v25  ;;  %766 = vmatprep.subr.bf16.mxu1 %v791_v31 }
  0x23   : > { %724 = vmatprep.mubr.msk.bf16.mxu0 %vm268_vm0, %v251_v26  ;;  %737 = vmatpush3.bf16.msra.mxu0 %v789_v20  ;;  %v674_v26 = vld [vmem:[%s952_s4] ss:$0 sm:$0xff] }
  0x24   : > { %738 = vmatprep.subr.bf16.mxu0 %v790_v30 }
  0x25   : > { %774 = vmatpush3.bf16.msra.mxu1 %v791_v31 }
  0x26   : > { %767 = vmatprep.subr.bf16.mxu1 %v792_v32 }
  0x27   : > { %739 = vmatpush3.bf16.msra.mxu0 %v790_v30 }
  0x28   : > { %740 = vmatprep.subr.bf16.mxu0 %v791_v31 }
  0x29   : > { %775 = vmatpush3.bf16.msra.mxu1 %v792_v32 }
  0x2a   : > { %725 = vmatmul.mubr.msk.bf16.gmra.mxu0 %vm268_vm0, %v252_v29 }
  0x2b   : > { %741 = vmatpush3.bf16.msra.mxu0 %v791_v31 }
  0x2c   : > { %742 = vmatprep.subr.bf16.mxu0 %v792_v32 }
  0x2f   : > { %743 = vmatpush3.bf16.msra.mxu0 %v792_v32 }
  0xd2   : > { %v714_v33 = vpop.f32.mrf.mxu0 }
  0xd3   : > { %v336_v39 = vadd.f32 %v714_v33, %v664_v35 }
  0xd4   : > { %v327_v34 = vpop.f32.mrf.mxu0 }
  0xd5   : > { %v328_v37 = vadd.f32 %v664_v35, %v327_v34  ;;  %v392_v46 = vmax.f32 %v336_v39, 0.0 }
  0xd6   : > { %v715_v36 = vpop.f32.mrf.mxu0 }
  0xd7   : > { %v339_v38 = vadd.f32 %v715_v36, %v664_v35  ;;  %v390_v44 = vmax.f32 %v328_v37, 0.0 }
  0xd8   : > { %v330_v40 = vpop.f32.mrf.mxu0 }
  0xd9   : > { %v331_v41 = vadd.f32 %v664_v35, %v330_v40  ;;  %v393_v42 = vmax.f32 %v339_v38, 0.0 }
  0xda   : > { %v718_v43 = vpop.f32.mrf.mxu0 }
  0xdb   : > { %v391_v45 = vmax.f32 %v331_v41, 0.0  ;;  %v407_v49 = vpack.c.bf16 %v393_v42, %v392_v46  ;;  %v352_v53 = vadd.f32 %v718_v43, %v664_v35 }
  0xdc   : > { %v343_v47 = vpop.f32.mrf.mxu0 }
  0xdd   : > { %v406_v48 = vpack.c.bf16 %v391_v45, %v390_v44  ;;  %v344_v51 = vadd.f32 %v664_v35, %v343_v47  ;;  %v396_v60 = vmax.f32 %v352_v53, 0.0 }
  0xde   : > { %v719_v50 = vpop.f32.mrf.mxu0 }
  0xdf   : > { %v355_v52 = vadd.f32 %v719_v50, %v664_v35  ;;  %744 = vmatprep.mubr.bf16.mxu0 %v406_v48  ;;  %v394_v58 = vmax.f32 %v344_v51, 0.0 }
  0xe0   : > { %v346_v54 = vpop.f32.mrf.mxu0  ;;  %745 = vmatmul.mubr.bf16.vlgmr.msra.gmra.mxu0 %v407_v49 }
  0xe1   : > { %v347_v55 = vadd.f32 %v664_v35, %v346_v54  ;;  %v397_v56 = vmax.f32 %v355_v52, 0.0 }
  0xe2   : > { %v722_v57 = vpop.f32.mrf.mxu0 }
  0xe3   : > { %v395_v59 = vmax.f32 %v347_v55, 0.0  ;;  %v409_v63 = vpack.c.bf16 %v397_v56, %v396_v60  ;;  %v368_v3 = vadd.f32 %v722_v57, %v664_v35 }
  0xe4   : > { %v359_v61 = vpop.f32.mrf.mxu0 }
  0xe5   : > { %v408_v62 = vpack.c.bf16 %v395_v59, %v394_v58  ;;  %v360_v1 = vadd.f32 %v664_v35, %v359_v61  ;;  %v400_v10 = vmax.f32 %v368_v3, 0.0 }
  0xe6   : > { %v723_v0 = vpop.f32.mrf.mxu0 }
  0xe7   : > { %v371_v2 = vadd.f32 %v723_v0, %v664_v35  ;;  %748 = vmatprep.mubr.bf16.mxu1 %v408_v62  ;;  %v398_v8 = vmax.f32 %v360_v1, 0.0 }
  0xe8   : > { %v362_v4 = vpop.f32.mrf.mxu0  ;;  %749 = vmatmul.mubr.bf16.vlgmr.msra.gmra.mxu1 %v409_v63 }
  0xe9   : > { %v363_v5 = vadd.f32 %v664_v35, %v362_v4  ;;  %v401_v6 = vmax.f32 %v371_v2, 0.0 }
  0xea   : > { %v726_v7 = vpop.f32.mrf.mxu0 }
  0xeb   : > { %v399_v9 = vmax.f32 %v363_v5, 0.0  ;;  %v411_v13 = vpack.c.bf16 %v401_v6, %v400_v10  ;;  %v384_v17 = vadd.f32 %v726_v7, %v664_v35 }
  0xec   : > { %v375_v11 = vpop.f32.mrf.mxu0 }
  0xed   : > { %v410_v12 = vpack.c.bf16 %v399_v9, %v398_v8  ;;  %v376_v15 = vadd.f32 %v664_v35, %v375_v11  ;;  %v404_v23 = vmax.f32 %v384_v17, 0.0 }
  0xee   : > { %v727_v14 = vpop.f32.mrf.mxu0 }
  0xef   : > { %v387_v16 = vadd.f32 %v727_v14, %v664_v35  ;;  %752 = vmatprep.mubr.bf16.mxu1 %v410_v12  ;;  %v402_v21 = vmax.f32 %v376_v15, 0.0 }
  0xf0   : > { %v378_v18 = vpop.f32.mrf.mxu0  ;;  %753 = vmatmul.mubr.bf16.gmra.mxu1 %v411_v13 }
  0xf1   : > { %v379_v19 = vadd.f32 %v664_v35, %v378_v18  ;;  %v405_v20 = vmax.f32 %v387_v16, 0.0 }
  0xf3   : > { %v403_v22 = vmax.f32 %v379_v19, 0.0  ;;  %v413_v25 = vpack.c.bf16 %v405_v20, %v404_v23 }
  0xf5   : > { %v412_v24 = vpack.c.bf16 %v403_v22, %v402_v21 }
  0xf7   : > { %756 = vmatprep.mubr.bf16.mxu1 %v412_v24 }
  0xf8   : > { %757 = vmatmul.mubr.bf16.gmra.mxu1 %v413_v25 }
 0x1a0   : > { %v746_v27 = vpop.f32.mrf.mxu0 }
 0x1a1   : > { %v528_v28 = vadd.f32 %v746_v27, %v674_v26 }
 0x1a2   : > { %v519_v29 = vpop.f32.mrf.mxu0 }
 0x1a3   : > { %585 = vst.msk [vmem:[%s911_s26 + $0x10] sm:$0xff] %vm582_vm1, %v528_v28  ;;  %v520_v30 = vadd.f32 %v674_v26, %v519_v29 }
 0x1a4   : > { %v747_v31 = vpop.f32.mrf.mxu0 }
 0x1a5   : > { %583 = vst.msk [vmem:[%s911_s26] sm:$0xff] %vm582_vm1, %v520_v30  ;;  %v531_v32 = vadd.f32 %v747_v31, %v674_v26 }
 0x1a6   : > { %v522_v33 = vpop.f32.mrf.mxu0 }
 0x1a7   : > { %586 = vst.msk [vmem:[%s911_s26 + $0x18] sm:$0xff] %vm582_vm1, %v531_v32  ;;  %v523_v34 = vadd.f32 %v674_v26, %v522_v33 }
 0x1a8   : > { %v750_v35 = vpop.f32.mrf.mxu1 }
 0x1a9   : > { %584 = vst.msk [vmem:[%s911_s26 + $0x8] sm:$0xff] %vm582_vm1, %v523_v34  ;;  %v544_v36 = vadd.f32 %v750_v35, %v674_v26 }
 0x1aa   : > { %v535_v37 = vpop.f32.mrf.mxu1 }
 0x1ab   : > { %589 = vst.msk [vmem:[%s911_s26 + $0x30] sm:$0xff] %vm582_vm1, %v544_v36  ;;  %v536_v38 = vadd.f32 %v674_v26, %v535_v37 }
 0x1ac   : > { %v751_v39 = vpop.f32.mrf.mxu1 }
 0x1ad   : > { %587 = vst.msk [vmem:[%s911_s26 + $0x20] sm:$0xff] %vm582_vm1, %v536_v38  ;;  %v547_v40 = vadd.f32 %v751_v39, %v674_v26 }
 0x1ae   : > { %v538_v41 = vpop.f32.mrf.mxu1 }
 0x1af   : > { %590 = vst.msk [vmem:[%s911_s26 + $0x38] sm:$0xff] %vm582_vm1, %v547_v40  ;;  %v539_v42 = vadd.f32 %v674_v26, %v538_v41 }
 0x1b0   : > { %v754_v43 = vpop.f32.mrf.mxu1 }
 0x1b1   : > { %588 = vst.msk [vmem:[%s911_s26 + $0x28] sm:$0xff] %vm582_vm1, %v539_v42  ;;  %v560_v44 = vadd.f32 %v754_v43, %v674_v26 }
 0x1b2   : > { %v551_v45 = vpop.f32.mrf.mxu1 }
 0x1b3   : > { %593 = vst.msk [vmem:[%s911_s26 + $0x50] sm:$0xff] %vm582_vm1, %v560_v44  ;;  %v552_v46 = vadd.f32 %v674_v26, %v551_v45 }
 0x1b4   : > { %v755_v47 = vpop.f32.mrf.mxu1 }
 0x1b5   : > { %591 = vst.msk [vmem:[%s911_s26 + $0x40] sm:$0xff] %vm582_vm1, %v552_v46  ;;  %v563_v48 = vadd.f32 %v755_v47, %v674_v26 }
 0x1b6   : > { %v554_v49 = vpop.f32.mrf.mxu1 }
 0x1b7   : > { %594 = vst.msk [vmem:[%s911_s26 + $0x58] sm:$0xff] %vm582_vm1, %v563_v48  ;;  %v555_v50 = vadd.f32 %v674_v26, %v554_v49 }
 0x1b8   : > { %v758_v51 = vpop.f32.mrf.mxu1 }
 0x1b9   : > { %592 = vst.msk [vmem:[%s911_s26 + $0x48] sm:$0xff] %vm582_vm1, %v555_v50  ;;  %v576_v52 = vadd.f32 %v758_v51, %v674_v26 }
 0x1ba   : > { %v567_v53 = vpop.f32.mrf.mxu1 }
 0x1bb   : > { %597 = vst.msk [vmem:[%s911_s26 + $0x70] sm:$0xff] %vm582_vm1, %v576_v52  ;;  %v568_v54 = vadd.f32 %v674_v26, %v567_v53 }
 0x1bc   : > { %v759_v55 = vpop.f32.mrf.mxu1 }
 0x1bd   : > { %595 = vst.msk [vmem:[%s911_s26 + $0x60] sm:$0xff] %vm582_vm1, %v568_v54  ;;  %v579_v56 = vadd.f32 %v759_v55, %v674_v26 }
 0x1be   : > { %v570_v57 = vpop.f32.mrf.mxu1 }
 0x1bf   : > { %598 = vst.msk [vmem:[%s911_s26 + $0x78] sm:$0xff] %vm582_vm1, %v579_v56  ;;  %v571_v58 = vadd.f32 %v674_v26, %v570_v57 }
 0x1c1   : > { %596 = vst.msk [vmem:[%s911_s26 + $0x68] sm:$0xff] %vm582_vm1, %v571_v58 }
 0x1c2 PF: > { %s15_s18 = sadd.s32 1, %s799_s18  }
 0x1c3   : > { %p12_p4 = scmp.ge.s32.totalorder %s15_s18, 4  }
 0x1c5   :  { %14 = sbr.rel (!%p12_p4) target bundleno = 1 (0x1), region = 70 }

</bundles_post_ra>
